<compile_context>
chip_gen: v7x
topology: tpu7x:2x2x1
jax: 0.10.0
libtpu: 0.0.40
codegen_flags: <defaults>
</compile_context>

<pallas_src>
import functools

import jax
import jax.numpy as jnp
from jax import lax
from jax.experimental import pallas as pl
from jax.experimental.pallas import tpu as pltpu


def _reg_loss_kernel(x_ref, y_ref, out_ref, acc_ref, *,
                     batch, block_b, block_d, two_npairs, inv_scale,
                     needs_row_mask):
    j = pl.program_id(0)            # feature ("pair") split index, "parallel"
    i = pl.program_id(1)            # batch tile index, "arbitrary" (reduction)
    last_i = pl.num_programs(1) - 1

    @pl.when(i == 0)
    def _init():
        acc_ref[...] = jnp.zeros_like(acc_ref)

    x = x_ref[...].astype(jnp.float32)          # [block_b, block_d]
    y = y_ref[...].astype(jnp.float32)

    # Pair-combine adjacent lanes in-register with an XLU rotate (no gather):
    #   rolled[..., l] = v[..., (l + 1) % block_d]
    def pair_sum(v):
        return v + pltpu.roll(v, shift=block_d - 1, axis=1)

    dot = pair_sum(x * y)            # even lanes: x_e*y_e + x_o*y_o
    xsq = pair_sum(x * x)            # even lanes: ||x_pair||^2
    ysq = pair_sum(y * y)            # even lanes: ||y_pair||^2
    # Two rsqrt (EUP slot otherwise idle) instead of rsqrt(xsq*ysq): avoids
    # overflow of the product and tracks the reference sqrt*sqrt/div closely.
    cos = dot * (lax.rsqrt(xsq) * lax.rsqrt(ysq))

    # Odd / overflow lanes may carry garbage; they are masked once in
    # _finalize.  Only a statically-known partial last batch tile needs a
    # row mask (padded rows hold undefined VMEM contents).
    if needs_row_mask:
        @pl.when(i != last_i)
        def _acc_full():
            acc_ref[...] += jnp.sum(cos, axis=0, keepdims=True)

        @pl.when(i == last_i)
        def _acc_masked():
            row = lax.broadcasted_iota(jnp.int32, cos.shape, 0) + i * block_b
            cos_m = jnp.where(row < batch, cos, 0.0)
            acc_ref[...] += jnp.sum(cos_m, axis=0, keepdims=True)
    else:
        acc_ref[...] += jnp.sum(cos, axis=0, keepdims=True)

    @pl.when(i == last_i)
    def _finalize():
        s = acc_ref[...]                                      # [1, block_d]
        lane = lax.broadcasted_iota(jnp.int32, s.shape, 1) + j * block_d
        pair_lane = (lane % 2 == 0) & (lane < two_npairs)
        diff = jnp.where(pair_lane, s - 1.0, 0.0)
        out_ref[0] = jnp.sum(diff * diff, keepdims=True) * inv_scale


def _align_down(v, m):
    return (v // m) * m


def _align_up(v, m):
    return -(-v // m) * m


def reg_loss_pallas(x, y, size_average=True, *, block_b=None):
    """x, y: [batch, 1, ndims] (or any [batch, ...]); returns scalar f32 loss."""
    B = x.shape[0]
    xf = jnp.reshape(x, (B, -1))        # free reshape; dtype kept (upcast in-kernel)
    yf = jnp.reshape(y, (B, -1))
    ndims = xf.shape[1]
    npairs = ndims // 2                 # pairs touched by range(0, ndims - 1, 2)
    itemsize = jnp.dtype(xf.dtype).itemsize

    # ---- feature ("pair") split: engages both v7x TensorCores -------------
    # Each split keeps whole pairs and stays a multiple of 128 lanes.
    nsplit = 2 if (ndims % 256 == 0 and ndims >= 256) else 1
    block_d = ndims // nsplit

    # ---- VMEM / tile-size heuristic (bytes-based, generation-aware) -------
    try:
        phys_vmem = int(pltpu.get_tpu_info().vmem_capacity_bytes)
    except Exception:
        phys_vmem = 64 << 20
    vmem_budget = (phys_vmem * 3) // 4      # ~48 MiB v7x, ~96 MiB v5e/v6e

    # dtype-aware sublane alignment for the batch (sublane) dimension.
    sub = {1: 32, 2: 16}.get(itemsize, 8)

    # 2 inputs x 2 pipeline buffers + ~6 f32 intermediates of the same tile.
    per_buf_bytes = min(4 << 20, vmem_budget // (4 + 6 * (4 // itemsize)))

    if B <= sub:
        block_b = B                          # tiny batch: full-extent block
    elif block_b is None:
        rows = per_buf_bytes // max(block_d * itemsize, 1)
        block_b = max(sub, _align_down(rows, sub))
        if block_b >= B:
            # Whole batch fits in one tile: force a few grid steps when the
            # stream is non-trivial so input DMA overlaps compute.
            if 2 * B * ndims * itemsize > (4 << 20):
                block_b = max(sub, _align_up(_align_up(B, 4) // 4, sub))
            else:
                block_b = B
    else:
        block_b = int(block_b)
        if block_b >= B:
            block_b = B
        else:
            block_b = max(sub, _align_down(block_b, sub))

    nb = _align_up(B, block_b) // block_b
    needs_row_mask = (B % block_b) != 0
    inv_scale = 1.0 / (float(B) * float(max(npairs, 1))) if size_average else 1.0

    kernel = functools.partial(
        _reg_loss_kernel,
        batch=B, block_b=block_b, block_d=block_d,
        two_npairs=2 * npairs, inv_scale=inv_scale,
        needs_row_mask=needs_row_mask,
    )

    cost = pl.CostEstimate(
        flops=int(10 * B * ndims),
        transcendentals=int(2 * B * max(npairs, 1)),
        bytes_accessed=int(2 * B * ndims * itemsize + 4 * nsplit),
    )

    out = pl.pallas_call(
        kernel,
        out_shape=jax.ShapeDtypeStruct((nsplit, 1, 1), jnp.float32),
        grid_spec=pltpu.PrefetchScalarGridSpec(
            num_scalar_prefetch=0,
            grid=(nsplit, nb),
            in_specs=[
                pl.BlockSpec((block_b, block_d), lambda j, i: (i, j)),
                pl.BlockSpec((block_b, block_d), lambda j, i: (i, j)),
            ],
            out_specs=pl.BlockSpec((1, 1, 1), lambda j, i: (j, 0, 0)),
            scratch_shapes=[pltpu.VMEM((1, block_d), jnp.float32)],
        ),
        compiler_params=pltpu.CompilerParams(
            dimension_semantics=("parallel", "arbitrary"),
            vmem_limit_bytes=int(vmem_budget),
        ),
        cost_estimate=cost,
    )(xf, yf)
    # Loss is additive over disjoint pair-splits.
    return jnp.sum(out)


def _reg_loss_ref(x, y, size_average=True):
    """Pure-JAX reference with the exact PyTorch math (sqrt + divide)."""
    B = x.shape[0]
    xf = jnp.reshape(x, (B, -1)).astype(jnp.float32)
    yf = jnp.reshape(y, (B, -1)).astype(jnp.float32)
    ndims = xf.shape[1]
    npairs = ndims // 2
    xp = xf[:, :2 * npairs].reshape(B, npairs, 2)
    yp = yf[:, :2 * npairs].reshape(B, npairs, 2)
    dot = jnp.sum(xp * yp, axis=-1)
    xn = jnp.sqrt(jnp.sum(xp * xp, axis=-1))
    yn = jnp.sqrt(jnp.sum(yp * yp, axis=-1))
    s = jnp.sum(dot / (xn * yn), axis=0)
    loss = jnp.sum((s - 1.0) ** 2)
    if size_average:
        loss = loss / B / (ndims // 2)
    return loss


if __name__ == "__main__":
    key = jax.random.PRNGKey(0)
    k1, k2, k3, k4, k5, k6 = jax.random.split(key, 6)

    # Case 1: lane-dense feature dim, pair-split "parallel" axis (nsplit=2).
    B1, D1 = 16, 256
    x1 = jax.random.normal(k1, (B1, 1, D1), dtype=jnp.float32)
    y1 = jax.random.normal(k2, (B1, 1, D1), dtype=jnp.float32)
    out1 = jax.block_until_ready(reg_loss_pallas(x1, y1, size_average=True))
    ref1 = _reg_loss_ref(x1, y1, size_average=True)
    assert jnp.allclose(out1, ref1, rtol=1e-4, atol=1e-5), (out1, ref1)

    # Case 1b: size_average=False path.
    out1b = jax.block_until_ready(reg_loss_pallas(x1, y1, size_average=False))
    ref1b = _reg_loss_ref(x1, y1, size_average=False)
    assert jnp.allclose(out1b, ref1b, rtol=1e-4, atol=1e-4), (out1b, ref1b)

    # Case 2: multi-step batch grid with a partial (row-masked) last tile.
    B2, D2 = 20, 128
    x2 = jax.random.normal(k3, (B2, 1, D2), dtype=jnp.float32)
    y2 = jax.random.normal(k4, (B2, 1, D2), dtype=jnp.float32)
    out2 = jax.block_until_ready(reg_loss_pallas(x2, y2, size_average=True, block_b=8))
    ref2 = _reg_loss_ref(x2, y2, size_average=True)
    assert jnp.allclose(out2, ref2, rtol=1e-4, atol=1e-5), (out2, ref2)

    # Case 3: bf16 inputs (dtype-aware sublane alignment, in-kernel upcast).
    B3, D3 = 32, 256
    x3 = jax.random.normal(k5, (B3, 1, D3), dtype=jnp.float32).astype(jnp.bfloat16)
    y3 = jax.random.normal(k6, (B3, 1, D3), dtype=jnp.float32).astype(jnp.bfloat16)
    out3 = jax.block_until_ready(reg_loss_pallas(x3, y3, size_average=True))
    ref3 = _reg_loss_ref(x3, y3, size_average=True)
    assert jnp.allclose(out3, ref3, rtol=2e-3, atol=2e-3), (out3, ref3)

    print("KERNEL_OK")
</pallas_src>

<mosaic_0001>
module attributes {stable_mosaic.version = 11 : i64} {
  func.func @_reg_loss_kernel(%arg0: i32, %arg1: i32, %arg2: memref<16x128xf32, #tpu.memory_space<vmem>>, %arg3: memref<16x128xf32, #tpu.memory_space<vmem>>, %arg4: memref<1x1x1xf32, #tpu.memory_space<vmem>>, %arg5: memref<1x128xf32, #tpu.memory_space<vmem>>) attributes {dimension_semantics = [#tpu.dimension_semantics<parallel>, #tpu.dimension_semantics<arbitrary>], iteration_bounds = array<i64: 2, 1>, scalar_prefetch = 0 : i64, scratch_operands = 1 : i64, tpu.core_type = #tpu.core_type<tc>, window_params = [{transform_indices = @transform_0, window_bounds = array<i64: 16, 128>}, {transform_indices = @transform_1, window_bounds = array<i64: 16, 128>}, {transform_indices = @transform_2, window_bounds = array<i64: 1, 1, 1>}]} {
    %c0_i32 = arith.constant 0 : i32
    %0 = arith.cmpi eq, %arg1, %c0_i32 : i32
    %1 = arith.extui %0 : i1 to i32
    %c0_i32_0 = arith.constant 0 : i32
    %2 = arith.cmpi ne, %1, %c0_i32_0 : i32
    scf.if %2 {
      %cst_12 = arith.constant 0.000000e+00 : f32
      %26 = vector.broadcast %cst_12 : f32 to vector<1x128xf32>
      %c0_13 = arith.constant 0 : index
      %c0_14 = arith.constant 0 : index
      %27 = vector.load %arg5[%c0_13, %c0_14] : memref<1x128xf32, #tpu.memory_space<vmem>>, vector<1x128xf32>
      tpu.vector_store %arg5[%c0_13, %c0_14], %26 {strides = array<i32>} : memref<1x128xf32, #tpu.memory_space<vmem>>, vector<1x128xf32>,
    } else {
    }
    %c0 = arith.constant 0 : index
    %c0_1 = arith.constant 0 : index
    %3 = vector.load %arg2[%c0, %c0_1] : memref<16x128xf32, #tpu.memory_space<vmem>>, vector<16x128xf32>
    %c0_2 = arith.constant 0 : index
    %c0_3 = arith.constant 0 : index
    %4 = vector.load %arg3[%c0_2, %c0_3] : memref<16x128xf32, #tpu.memory_space<vmem>>, vector<16x128xf32>
    %5 = arith.mulf %3, %4 : vector<16x128xf32>
    %c127_i32 = arith.constant 127 : i32
    %6 = tpu.dynamic_rotate %5 by %c127_i32 dim 1 : vector<16x128xf32>, i32 -> vector<16x128xf32>
    %7 = arith.addf %5, %6 : vector<16x128xf32>
    %8 = arith.mulf %3, %3 : vector<16x128xf32>
    %c127_i32_4 = arith.constant 127 : i32
    %9 = tpu.dynamic_rotate %8 by %c127_i32_4 dim 1 : vector<16x128xf32>, i32 -> vector<16x128xf32>
    %10 = arith.addf %8, %9 : vector<16x128xf32>
    %11 = arith.mulf %4, %4 : vector<16x128xf32>
    %c127_i32_5 = arith.constant 127 : i32
    %12 = tpu.dynamic_rotate %11 by %c127_i32_5 dim 1 : vector<16x128xf32>, i32 -> vector<16x128xf32>
    %13 = arith.addf %11, %12 : vector<16x128xf32>
    %14 = math.rsqrt %10 : vector<16x128xf32>
    %15 = math.rsqrt %13 : vector<16x128xf32>
    %16 = arith.mulf %14, %15 : vector<16x128xf32>
    %17 = arith.mulf %7, %16 : vector<16x128xf32>
    %c0_6 = arith.constant 0 : index
    %c0_7 = arith.constant 0 : index
    %18 = vector.load %arg5[%c0_6, %c0_7] : memref<1x128xf32, #tpu.memory_space<vmem>>, vector<1x128xf32>
    %cst = arith.constant dense<0.000000e+00> : vector<128xf32>
    %19 = vector.multi_reduction <add>, %17, %cst [0] : vector<16x128xf32> to vector<128xf32>
    %20 = vector.shape_cast %19 : vector<128xf32> to vector<1x128xf32>
    %21 = arith.addf %18, %20 : vector<1x128xf32>
    %c0_8 = arith.constant 0 : index
    %c0_9 = arith.constant 0 : index
    %22 = vector.load %arg5[%c0_8, %c0_9] : memref<1x128xf32, #tpu.memory_space<vmem>>, vector<1x128xf32>
    tpu.vector_store %arg5[%c0_8, %c0_9], %21 {strides = array<i32>} : memref<1x128xf32, #tpu.memory_space<vmem>>, vector<1x128xf32>,
    %c0_i32_10 = arith.constant 0 : i32
    %23 = arith.cmpi eq, %arg1, %c0_i32_10 : i32
    %24 = arith.extui %23 : i1 to i32
    %c0_i32_11 = arith.constant 0 : i32
    %25 = arith.cmpi ne, %24, %c0_i32_11 : i32
    scf.if %25 {
      %c0_12 = arith.constant 0 : index
      %c0_13 = arith.constant 0 : index
      %26 = vector.load %arg5[%c0_12, %c0_13] : memref<1x128xf32, #tpu.memory_space<vmem>>, vector<1x128xf32>
      %27 = tpu.iota {dimensions = array<i32: 1>} : vector<1x128xi32>
      %c128_i32 = arith.constant 128 : i32
      %28 = arith.muli %arg0, %c128_i32 : i32
      %29 = vector.broadcast %28 : i32 to vector<1x128xi32>
      %30 = arith.addi %27, %29 : vector<1x128xi32>
      %c2_i32 = arith.constant 2 : i32
      %c0_i32_14 = arith.constant 0 : i32
      %31 = arith.cmpi eq, %c2_i32, %c0_i32_14 : i32
      %c1_i32 = arith.constant 1 : i32
      %32 = arith.select %31, %c1_i32, %c2_i32 : i32
      %33 = vector.broadcast %32 : i32 to vector<1x128xi32>
      %34 = arith.remsi %30, %33 : vector<1x128xi32>
      %c0_i32_15 = arith.constant 0 : i32
      %35 = vector.broadcast %c0_i32_15 : i32 to vector<1x128xi32>
      %36 = arith.cmpi ne, %34, %35 : vector<1x128xi32>
      %c0_i32_16 = arith.constant 0 : i32
      %37 = vector.broadcast %c0_i32_16 : i32 to vector<1x128xi32>
      %38 = arith.cmpi slt, %34, %37 : vector<1x128xi32>
      %c0_i32_17 = arith.constant 0 : i32
      %39 = arith.cmpi slt, %32, %c0_i32_17 : i32
      %40 = vector.broadcast %39 : i1 to vector<1x128xi1>
      %41 = vector.broadcast %40 : vector<1x128xi1> to vector<1x128xi1>
      %42 = arith.xori %38, %41 : vector<1x128xi1>
      %43 = arith.andi %42, %36 : vector<1x128xi1>
      %44 = vector.broadcast %32 : i32 to vector<1x128xi32>
      %45 = arith.addi %34, %44 : vector<1x128xi32>
      %46 = arith.select %43, %45, %34 : vector<1x128xi1>, vector<1x128xi32>
      %c0_i32_18 = arith.constant 0 : i32
      %47 = vector.broadcast %c0_i32_18 : i32 to vector<1x128xi32>
      %48 = arith.cmpi eq, %46, %47 : vector<1x128xi32>
      %c256_i32 = arith.constant 256 : i32
      %49 = vector.broadcast %c256_i32 : i32 to vector<1x128xi32>
      %50 = arith.cmpi slt, %30, %49 : vector<1x128xi32>
      %51 = arith.andi %48, %50 : vector<1x128xi1>
      %cst_19 = arith.constant 1.000000e+00 : f32
      %52 = vector.broadcast %cst_19 : f32 to vector<1x128xf32>
      %53 = arith.subf %26, %52 : vector<1x128xf32>
      %cst_20 = arith.constant 0.000000e+00 : f32
      %54 = vector.broadcast %cst_20 : f32 to vector<1x128xf32>
      %55 = arith.select %51, %53, %54 : vector<1x128xi1>, vector<1x128xf32>
      %56 = arith.mulf %55, %55 : vector<1x128xf32>
      %57 = vector.shape_cast %56 : vector<1x128xf32> to vector<1x1x128xf32>
      %cst_21 = arith.constant dense<0.000000e+00> : vector<1xf32>
      %58 = vector.multi_reduction <add>, %57, %cst_21 [1, 2] : vector<1x1x128xf32> to vector<1xf32>
      %59 = vector.shape_cast %58 : vector<1xf32> to vector<1x1x1xf32>
      %60 = vector.extract %59[0, 0, 0] : f32 from vector<1x1x1xf32>
      %61 = vector.broadcast %60 : f32 to vector<1x1xf32>
      %cst_22 = arith.constant 4.8828125E-4 : f32
      %62 = vector.broadcast %cst_22 : f32 to vector<1x1xf32>
      %63 = arith.mulf %61, %62 : vector<1x1xf32>
      %c0_23 = arith.constant 0 : index
      %c0_24 = arith.constant 0 : index
      %c0_25 = arith.constant 0 : index
      %64 = vector.load %arg4[%c0_23, %c0_24, %c0_25] : memref<1x1x1xf32, #tpu.memory_space<vmem>>, vector<1x1x1xf32>
      %65 = vector.shape_cast %64 : vector<1x1x1xf32> to vector<1x1xf32>
      %66 = vector.shape_cast %63 : vector<1x1xf32> to vector<1x1x1xf32>
      tpu.vector_store %arg4[%c0_23, %c0_24, %c0_25], %66 {strides = array<i32>} : memref<1x1x1xf32, #tpu.memory_space<vmem>>, vector<1x1x1xf32>,
    } else {
    }
    return
  }
  func.func @transform_0(%arg0: i32, %arg1: i32) -> (i32, i32) {
    %c0_i32 = arith.constant 0 : i32
    return %arg1, %arg0 : i32, i32
  }
  func.func @transform_1(%arg0: i32, %arg1: i32) -> (i32, i32) {
    %c0_i32 = arith.constant 0 : i32
    return %arg1, %arg0 : i32, i32
  }
  func.func @transform_2(%arg0: i32, %arg1: i32) -> (i32, i32, i32) {
    %c0_i32 = arith.constant 0 : i32
    %c0_i32_0 = arith.constant 0 : i32
    %c0_i32_1 = arith.constant 0 : i32
    return %arg0, %c0_i32, %c0_i32_0 : i32, i32, i32
  }
}

</mosaic_0001>

<bundles_post_ra>
// kernel: tpu_custom_call.1
= control target key start
LH: loop header
LB: loop body
LE: loop exit
PB: predicated region body
PF: predicated region fallthrough
CT: control target
= control target key end

     0   :  { %7 = vsyncpa [#allocation4], 0  ;;  %s825_s0 = inlined_call_operand.hbm [shape: f32[16,256], index: 0, kind: input, shape index: {}]   ;;  %s826_s1 = inlined_call_operand.hbm [shape: f32[16,256], index: 1, kind: input, shape index: {}]   ;;  %s827_s2 = inlined_call_operand.vmem [shape: f32[2,1,1], index: 2, kind: output, shape index: {}]  }
   0x1   :  { %9 = vsyncpa [#allocation4 + $0x1], 0 }
   0x2   :  { %10 = vsyncpa [#allocation6], 0 }
   0x3   :  { %12 = vsyncpa [#allocation6 + $0x1], 0  ;;  %s638_s9 = smov 0   ;;  %s640_s10 = smov 0  }
   0x4   :  { %s642_s11 = smov 0   ;;  %s644_s12 = smov 0  }
   0x5   :  { %s646_s13 = smov 0   ;;  %s648_s14 = smov 0  }
   0x6 LB: > { %s409_s15 = sadd.s32 4294967295, %s614_s14   ;;  %s30_s16 = sadd.s32 1, %s610_s13  ;;  %s614_s14 = sphi %s648_s14, %s18_s14   ;;  %s610_s13 = sphi %s646_s13, %s839_s13   ;;  %s606_s12 = sphi %s644_s12, %s838_s12   ;;  %s602_s11 = sphi %s642_s11, %s837_s11   ;;  %s598_s10 = sphi %s640_s10, %s836_s10   ;;  %s594_s9 = sphi %s638_s9, %s835_s9  }
   0x7   : > { %p32_p0 = scmp.ge.s32.totalorder %s30_s16, 2  ;;  %s39_s17 = sadd.s32 1, %s602_s11 }
   0x8   : > { %p46_p1 = scmp.ne.s32.totalorder %s602_s11, %s598_s10  ;;  %p47_p2 = scmp.eq.s32.totalorder %s614_s14, 0 }
   0x9   : > { %s841_s16 = smov (%p32_p0, %s30_s16), 0  ;;  %p52_p4 = scmp.ne.s32.totalorder %s598_s10, %s594_s9 }
   0xa   : > { %p674_p3 = por %p47_p2, %p46_p1  ;;  %s35_s19 = ssub.s32 %s610_s13, %s841_s16 }
   0xb   : > { %p53_p5 = scmp.eq.s32.totalorder %s409_s15, 0  ;;  %p37_p6 = scmp.eq.s32.totalorder %s35_s19, 0 }
   0xc   : > { %p438_p8 = scmp.lt.s32.totalorder %s614_s14, 2  ;;  %s690_s22 = sand.u32 1, %s602_s11  }
   0xd   : > { %p681_p7 = por %p53_p5, %p52_p4  ;;  %s414_s23 = sshll.u32 %s610_s13, 7 }
   0xe   : > { %s687_s21 = scalar_select %p37_p6, %s602_s11, %s39_s17  }
   0xf   : > { %s830_s20 = scalar_select %p681_p7, 1, 0 }
  0x10   : > { %s413_s24 = sshll.u32 %s690_s22, 4  ;;  %s699_s27 = scalar_lea.hbm %s825_s0, %s414_s23 }
  0x11   : > { %s134_s28 = scalar_lea.vmem [#allocation3], %s413_s24  ;;  %p705_p9 = pnand %p438_p8, %p674_p3 }
  0x12   : > { %s143_s29 = sshll.u32 %s134_s28, 4  ;;  %s131_s3 = scalar_lea.sflag [#allocation4], %s690_s22  ;;  %s709_s29 = int_to_ptr.vmem [resolvable:$true] %s143_s29 }
  0x13   : > { %s500_s4 = scalar_lea.hbm %s699_s27, 256  ;;  %p502_p12 = pneg %p705_p9 }
  0x14   : > { %p501_p11 = scmp.ne.s32.totalorder %s699_s27, %s500_s4  ;;  %s505_s7 = scalar_lea.hbm %s825_s0, 512 }
  0x15   : > { %p506_p1 = scmp.lt.u32.totalorder %s699_s27, %s825_s0  ;;  %p507_p2 = scmp.lt.u32.totalorder %s505_s7, %s500_s4 }
  0x16   : > { %p503_p13 = pnand %p502_p12, %p501_p11  ;;  %p509_p4 = scmp.lt.u32.totalorder %s500_s4, %s699_s27 }
  0x17   : > { %p508_p3 = por %p507_p2, %p506_p1 }
  0x18   : > { %p504_p0 = pneg %p503_p13 }
  0x19   : > { %p510_p5 = por %p509_p4, %p508_p3 }
  0x1b   : > { %p511_p6 = pnand %p510_p5, %p504_p0 }
  0x1d   : > { %514 = shalt.err (!%p511_p6)
}
  0x1e   : > { %s515_s15 = scalar_lea.vmem %s709_s29, 256  ;;  %s616_s17 = smov [#allocation3]  }
  0x1f   : > { %p516_p8 = scmp.ne.s32.totalorder %s709_s29, %s515_s15  ;;  %s520_s18 = sshll.u32 %s616_s17, 4  ;;  %s521_s18 = int_to_ptr.vmem [resolvable:$false] %s520_s18 }
  0x20   : > { %s522_s19 = scalar_lea.vmem %s521_s18, 512  ;;  %p523_p10 = scmp.lt.s32.totalorder %s709_s29, %s521_s18 }
  0x21   : > { %p518_p11 = pnand %p516_p8, %p502_p12  ;;  %p524_p1 = scmp.lt.s32.totalorder %s522_s19, %s515_s15 }
  0x23   : > { %p519_p13 = pneg %p518_p11  ;;  %p525_p2 = por %p524_p1, %p523_p10 }
  0x25   : > { %p526_p3 = pnand %p525_p2, %p519_p13 }
  0x27   : > { %529 = shalt.err (!%p526_p3)
}
  0x28   : > { %s617_s25 = smov 256   ;;  %s618_s26 = smov 128  }
  0x29   : > { %s619_s28 = smov 8   ;;  %p174_p10 = scmp.lt.s32.totalorder %s614_s14, 3 }
  0x2a   : > { %434 = dma.hbm_to_vmem [thread:$0]  (!%p705_p9), %s699_s27, 256, %s709_s29, %s131_s3, %s617_s25, %s618_s26, %s619_s28  }
  0x2b   : > { %s749_s6 = scalar_lea.hbm %s826_s1, %s414_s23  ;;  %p832_p0 = scmp.ge.s32.totalorder %s614_s14, 1 }
  0x2c   : > { %s157_s8 = scalar_lea.vmem [#allocation5], %s413_s24  ;;  %s154_s27 = scalar_lea.sflag [#allocation6], %s690_s22 }
  0x2d   : > { %p753_p4 = pnand %p832_p0, %p174_p10  ;;  %s166_s9 = sshll.u32 %s157_s8, 4  ;;  %s759_s9 = int_to_ptr.vmem [resolvable:$true] %s166_s9 }
  0x2e   : > { %s530_s29 = scalar_lea.hbm %s749_s6, 256  ;;  %s535_s15 = scalar_lea.hbm %s826_s1, 512 }
  0x2f   : > { %p531_p5 = scmp.ne.s32.totalorder %s749_s6, %s530_s29  ;;  %p536_p11 = scmp.lt.u32.totalorder %s749_s6, %s826_s1 }
  0x30   : > { %p537_p13 = scmp.lt.u32.totalorder %s535_s15, %s530_s29  ;;  %p539_p2 = scmp.lt.u32.totalorder %s530_s29, %s749_s6 }
  0x31   : > { %p533_p6 = pnand %p531_p5, %p502_p12 }
  0x32   : > { %p538_p1 = por %p537_p13, %p536_p11 }
  0x33   : > { %p534_p8 = pneg %p533_p6 }
  0x34   : > { %p540_p3 = por %p539_p2, %p538_p1 }
  0x36   : > { %p541_p10 = pnand %p540_p3, %p534_p8 }
  0x38   : > { %544 = shalt.err (!%p541_p10)
}
  0x39   : > { %s545_s24 = scalar_lea.vmem %s759_s9, 256  ;;  %s620_s19 = smov [#allocation5]  }
  0x3a   : > { %p546_p0 = scmp.ne.s32.totalorder %s759_s9, %s545_s24  ;;  %s550_s4 = sshll.u32 %s620_s19, 4  ;;  %s551_s4 = int_to_ptr.vmem [resolvable:$false] %s550_s4 }
  0x3b   : > { %s552_s5 = scalar_lea.vmem %s551_s4, 512  ;;  %p553_p7 = scmp.lt.s32.totalorder %s759_s9, %s551_s4 }
  0x3c   : > { %p548_p5 = pnand %p546_p0, %p502_p12  ;;  %p554_p11 = scmp.lt.s32.totalorder %s552_s5, %s545_s24 }
  0x3e   : > { %p549_p6 = pneg %p548_p5  ;;  %p555_p13 = por %p554_p11, %p553_p7 }
  0x40   : > { %p556_p1 = pnand %p555_p13, %p549_p6 }
  0x42   : > { %559 = shalt.err (!%p556_p1)
}
  0x43   : > { %437 = dma.hbm_to_vmem [thread:$0]  (!%p705_p9), %s749_s6, 256, %s759_s9, %s154_s27, %s617_s25, %s618_s26, %s619_s28  }
  0x44   : > { %178 = sbr.rel (%p753_p4) target bundleno = 456 (0x1c8), region = 28  ;;  %s180_s8 = sand.u32 (!%p753_p4), 1, %s598_s10  }
  0x45   : > { %s418_s29 = sshll.u32 (!%p753_p4), %s180_s8, 4  ;;  %s181_s23 = scalar_lea.sflag (!%p753_p4), [#allocation4], %s180_s8 }
  0x46   : > { %s184_s3 = scalar_lea.vmem (!%p753_p4), [#allocation3], %s418_s29  ;;  %p834_p7 = scmp.ne.s32.totalorder (!%p753_p4), %s830_s20, 0 }
  0x4b   : > { %585 = dma.done.wait (%p834_p7), %s181_s23, 256  }
  0x4c   : > { %587 = vsyncadd (%p834_p7), %s181_s23, 4294967040  ;;  %s190_s30 = scalar_lea.sflag [#allocation6], %s180_s8  ;;  %s193_s22 = scalar_lea.vmem [#allocation5], %s418_s29 }
  0x4d   : > { %589 = dma.done.wait (%p834_p7), %s190_s30, 256  }
  0x4e   : > { %591 = vsyncadd (%p834_p7), %s190_s30, 4294967040  ;;  %v621_v0 = vmov 0.0   ;;  %v229_v1 = vld [vmem:[%s193_s22] sm:$0xff]  ;;  %v230_v3 = vld [vmem:[%s193_s22 + $0x8] sm:$0xff]  ;;  %s622_s25 = smov 127   ;;  %v277_v15 = vlaneseq  ;;  %s420_s20 = sshll.u32 %s606_s12, 7 }
  0x4f   : > { %226 = vst [vmem:[#allocation2] sm:$0x1] %v621_v0  ;;  %v227_v2 = vld [vmem:[%s184_s3] sm:$0xff]  ;;  %v247_v4 = vmul.f32 %v229_v1, %v229_v1  ;;  %v228_v6 = vld [vmem:[%s184_s3 + $0x8] sm:$0xff]  ;;  %v248_v7 = vmul.f32 %v230_v3, %v230_v3  ;;  %v280_v21 = vstv %s420_s20  ;;  %vm300_vm7 = vcmask 1040384   ;;  %p219_p9 = scmp.lt.s32.totalorder %s606_s12, 1 }
  0x50   : > { %v239_v5 = vmul.f32 %v227_v2, %v227_v2  ;;  %v240_v8 = vmul.f32 %v228_v6, %v228_v6  ;;  %v231_v9 = vmul.f32 %v229_v1, %v227_v2  ;;  %v232_v10 = vmul.f32 %v230_v3, %v228_v6 }
  0x51   : > { %249 = vrot.lane.b32.xlu1 %v247_v4, %s622_s25  ;;  %v278_v20 = vand.u32 127, %v277_v15  ;;  %s843_s12 = smov (!%p219_p9, %s606_s12), 1  ;;  %vm313_vm8 = vcmask 0  }
  0x52   : > { %241 = vrot.lane.b32.xlu0 %v239_v5, %s622_s25  ;;  %s221_s7 = scalar_lea.vmem %s827_s2, %s843_s12 }
  0x53   : > { %v281_v22 = vadd.s32 %v280_v21, %v278_v20 }
  0x55   : > { %251 = vrot.lane.b32.xlu1 %v248_v7, %s622_s25  ;;  %v283_v27 = vsub.s32 0, %v281_v22  ;;  %vm282_vm0 = vcmp.lt.s32.totalorder %v281_v22, 0  ;;  %vm295_vm5 = vcmp.lt.s32.totalorder %v281_v22, 256 }
  0x56   : > { %243 = vrot.lane.b32.xlu0 %v240_v8, %s622_s25  ;;  %v263_v46 = vld [vmem:[#allocation2] sm:$0x1] }
  0x57   : > { %v421_v34 = vmin.u32 %v283_v27, %v281_v22 }
  0x59   : > { %235 = vrot.lane.b32.xlu1 %v232_v10, %s622_s25  ;;  %v286_v38 = vand.u32 1, %v421_v34 }
  0x5a   : > { %233 = vrot.lane.b32.xlu0 %v231_v9, %s622_s25 }
  0x5b   : > { %v287_v41 = vsub.s32 0, %v286_v38 }
  0x5d   : > { %v288_v44 = vsel %vm282_vm0, %v287_v41, %v286_v38 }
  0x5e   : > { %vm289_vm1 = vcmp.ne.s32.totalorder %v288_v44, 0  ;;  %vm290_vm2 = vcmp.lt.s32.totalorder %v288_v44, 0  ;;  %v292_v48 = vadd.s32 2, %v288_v44 }
  0x5f   : > { %vm291_vm3 = vmand %vm290_vm2, %vm289_vm1 }
  0x60   : > { %v293_v50 = vsel %vm291_vm3, %v292_v48, %v288_v44 }
  0x61   : > { %vm294_vm4 = vcmp.eq.s32.totalorder %v293_v50, 0 }
  0x62   : > { %vm296_vm6 = vmand %vm294_vm4, %vm295_vm5 }
  0xc3   : > { %v250_v11 = vpop.permute.xlu1 %249 }
  0xc4   : > { %v242_v12 = vpop.permute.xlu0 %241  ;;  %v253_v13 = vadd.f32 %v250_v11, %v247_v4 }
  0xc5   : > { %v245_v14 = vadd.f32 %v242_v12, %v239_v5 }
  0xc6   : > { %492 = vrsqrt.f32 %v253_v13 }
  0xc7   : > { %494 = vrsqrt.f32 %v245_v14  ;;  %v252_v16 = vpop.permute.xlu1 %251 }
  0xc8   : > { %v244_v17 = vpop.permute.xlu0 %243  ;;  %v254_v18 = vadd.f32 %v252_v16, %v248_v7 }
  0xc9   : > { %v246_v19 = vadd.f32 %v244_v17, %v240_v8 }
  0xca   : > { %496 = vrsqrt.f32 %v254_v18 }
  0xcb   : > { %498 = vrsqrt.f32 %v246_v19  ;;  %v236_v26 = vpop.permute.xlu1 %235 }
  0xcc   : > { %v234_v25 = vpop.permute.xlu0 %233  ;;  %v238_v31 = vadd.f32 %v236_v26, %v232_v10 }
  0xcd   : > { %v237_v30 = vadd.f32 %v234_v25, %v231_v9 }
  0xd0   : > { %v493_v23 = vpop.eup %492 }
  0xd1   : > { %v495_v24 = vpop.eup %494 }
  0xd2   : > { %v259_v29 = vmul.f32 %v495_v24, %v493_v23 }
  0xd4   : > { %v497_v28 = vpop.eup %496  ;;  %v261_v35 = vmul.f32 %v259_v29, %v237_v30 }
  0xd5   : > { %v499_v32 = vpop.eup %498 }
  0xd6   : > { %v260_v33 = vmul.f32 %v499_v32, %v497_v28 }
  0xd8   : > { %v262_v36 = vmul.f32 %v260_v33, %v238_v31 }
  0xda   : > { %v264_v37 = vadd.f32 %v262_v36, %v261_v35 }
  0xdc   : > { %v265_v39 = vrot.slane %v264_v37, 4 }
  0xde   : > { %v266_v40 = vadd.f32 %v265_v39, %v264_v37 }
  0xe0   : > { %v267_v42 = vrot.slane %v266_v40, 2 }
  0xe2   : > { %v268_v43 = vadd.f32 %v267_v42, %v266_v40 }
  0xe4   : > { %v269_v45 = vrot.slane %v268_v43, 1 }
  0xe6   : > { %v270_v47 = vadd.f32 %v269_v45, %v268_v43 }
  0xe8   : > { %v271_v49 = vadd.f32 %v270_v47, %v263_v46 }
  0xea   : > { %272 = vst [vmem:[#allocation2] sm:$0x1] %v271_v49 }
  0xf1   : > { %v276_v51 = vld [vmem:[#allocation2] sm:$0x1] }
  0xf2   : > { %v422_v52 = vadd.f32 -1.0, %v276_v51 }
  0xf4   : > { %v298_v53 = vsel %vm296_vm6, %v422_v52, 0.0 }
  0xf5   : > { %v299_v54 = vmul.f32 %v298_v53, %v298_v53 }
  0xf7   : > { %v301_v55 = vsel %vm300_vm7, %v299_v54, 0.0 }
  0xf8   : > { %302 = vadd.xlane.f32.xlu0 %v301_v55 }
 0x185   : > { %v303_v56 = vpop.xlane.xlu0 %302 }
 0x186   : > { %v304_v57 = vrot.slane %v303_v56, 4 }
 0x188   : > { %v305_v58 = vadd.f32 %v304_v57, %v303_v56 }
 0x18a   : > { %v306_v59 = vrot.slane %v305_v58, 2 }
 0x18c   : > { %v307_v60 = vadd.f32 %v306_v59, %v305_v58 }
 0x18e   : > { %v308_v61 = vrot.slane %v307_v60, 1 }
 0x190   : > { %v309_v62 = vadd.f32 %v308_v61, %v307_v60 }
 0x192   : > { %425 = vpush %v309_v62 }
 0x1c3   : > { %s426_s26 = spop %425 }
 0x1c4   : > { %v311_v63 = vstv %s426_s26 }
 0x1c5   : > { %v312_v0 = vmul.f32 0.00048828125, %v311_v63 }
 0x1c7   : > { %314 = vst.msk [vmem:[%s221_s7] sm:$0x1] %vm313_vm8, %v312_v0 }
 0x1c8 PF: > { %s18_s14 = sadd.s32 1, %s614_s14   ;;  %s835_s9 = smov %s598_s10 }
 0x1c9   : > { %p15_p12 = scmp.ge.s32.totalorder %s18_s14, 4   ;;  %s836_s10 = smov %s602_s11 }
 0x1ca   : > { %s837_s11 = smov %s687_s21  ;;  %s838_s12 = smov %s610_s13 }
 0x1cb   : > { %s839_s13 = smov %s841_s16  ;;  %17 = sbr.rel (!%p15_p12) target bundleno = 6 (0x6), region = 89 }
 0x1d2   :  { %332 = vsyncpa [#allocation4], 1 }
 0x1d3   :  { %334 = vsyncpa [#allocation4 + $0x1], 1 }
 0x1d4   :  { %335 = vsyncpa [#allocation6], 1 }
 0x1d5   :  { %337 = vsyncpa [#allocation6 + $0x1], 1 }

</bundles_post_ra>
